<compile_context>
chip_gen: v7x
topology: tpu7x:2x2x1
jax: 0.10.0
libtpu: 0.0.40
codegen_flags: <defaults>
</compile_context>

<pallas_src>
import math

import jax
import jax.numpy as jnp
from jax.experimental import pallas as pl
from jax.experimental.pallas import tpu as pltpu


_SQRT_HALF = 1.0 / math.sqrt(2.0)


def _erf(x):
    # Abramowitz & Stegun 7.1.26, |err| <= 1.5e-7. The divide is evaluated on
    # the EUP via pl.reciprocal(approx=True) so it does not occupy a VALU slot.
    p = 0.3275911
    a1, a2, a3, a4, a5 = (0.254829592, -0.284496736, 1.421413741,
                          -1.453152027, 1.061405429)
    s = jnp.where(x >= 0.0, 1.0, -1.0)
    z = jnp.abs(x)
    t = pl.reciprocal(1.0 + p * z, approx=True)
    poly = t * (a1 + t * (a2 + t * (a3 + t * (a4 + t * a5))))
    return s * (1.0 - poly * jnp.exp(-z * z))


def _gelu_exact(x):
    # PyTorch nn.GELU() default: 0.5 * x * (1 + erf(x / sqrt(2)))
    return 0.5 * x * (1.0 + _erf(x * _SQRT_HALF))


def feed_forward_kernel(x_ref, w1_ref, b1_ref, w2_ref, b2_ref, o_ref, acc_ref):
    k = pl.program_id(1)

    @pl.when(k == 0)
    def _init():
        acc_ref[...] = jnp.zeros_like(acc_ref)

    # First matmul: bf16 operands -> f32 MXU accumulation.
    x_bf16 = x_ref[...].astype(jnp.bfloat16)                         # (tm, dim)
    h = jnp.dot(x_bf16, w1_ref[...],
                preferred_element_type=jnp.float32)                  # (tm, tk) f32
    h = _gelu_exact(h + b1_ref[...])                                 # bias + GELU in f32
    # Dropout(p=0.0) at inference is the identity.

    # Second matmul: accumulate this hidden chunk's contribution in f32 scratch.
    acc_ref[...] += jnp.dot(h.astype(jnp.bfloat16), w2_ref[...],
                            preferred_element_type=jnp.float32)      # (tm, dim)

    @pl.when(k == pl.num_programs(1) - 1)
    def _finish():
        o_ref[...] = (acc_ref[...] + b2_ref[...]).astype(o_ref.dtype)


def _round_up(x, n):
    return -(-x // n) * n


def _pick_hidden_chunk(hidden):
    """Largest multiple of 128 <= min(hidden, 1024) that divides hidden; else
    fall back to the full hidden extent (single chunk, full-extent block)."""
    t = (min(hidden, 1024) // 128) * 128
    while t >= 128:
        if hidden % t == 0:
            return t
        t -= 128
    return hidden


def feed_forward(x, params):
    """x: (..., dim) float32. params: dict of pre-transposed bf16 weights, f32 biases."""
    *lead, dim = x.shape
    w1, b1, w2, b2 = params["w1"], params["b1"], params["w2"], params["b2"]
    hidden = w1.shape[1]

    x2 = x.reshape(-1, dim)
    m = x2.shape[0]

    # Row tile: multiple of 8 (sublane), capped at 512. Never shrink below the
    # natural size just to manufacture extra grid steps; ragged last row block
    # is handled by Pallas masking (rows are independent), so no pad/slice.
    tm = min(512, _round_up(m, 8))
    num_m = pl.cdiv(m, tm)

    # Hidden (reduction) chunk: stream W1[:, k], b1[k], W2[k, :] so weight VMEM
    # is bounded regardless of hidden_dim; accumulate in f32 scratch.
    tk = _pick_hidden_chunk(hidden)
    num_k = hidden // tk

    # Explicit VMEM budget from the actual buffers + ~30% headroom.
    est = (
        2 * tm * dim * 4 * 2              # x + out tiles, f32, double-buffered
        + 2 * (dim * tk + tk * dim) * 2   # W1/W2 chunks, bf16, double-buffered
        + 2 * 8 * (tk + dim) * 4          # biases (sublane-padded), f32
        + tm * dim * 4                    # f32 accumulator scratch
    )
    vmem_limit = min(64 << 20, max(16 << 20, int(est * 1.3) + (2 << 20)))

    out = pl.pallas_call(
        feed_forward_kernel,
        out_shape=jax.ShapeDtypeStruct((m, dim), x.dtype),
        grid=(num_m, num_k),
        in_specs=[
            pl.BlockSpec((tm, dim), lambda i, k: (i, 0)),     # x rows (resident over k)
            pl.BlockSpec((dim, tk), lambda i, k: (0, k)),     # W1 hidden chunk (bf16)
            pl.BlockSpec((1, tk), lambda i, k: (0, k)),       # b1 chunk (f32)
            pl.BlockSpec((tk, dim), lambda i, k: (k, 0)),     # W2 hidden chunk (bf16)
            pl.BlockSpec((1, dim), lambda i, k: (0, 0)),      # b2 (f32)
        ],
        out_specs=pl.BlockSpec((tm, dim), lambda i, k: (i, 0)),
        scratch_shapes=[pltpu.VMEM((tm, dim), jnp.float32)],
        compiler_params=pltpu.CompilerParams(
            dimension_semantics=("parallel", "arbitrary"),
            vmem_limit_bytes=vmem_limit,
        ),
    )(x2, w1, b1, w2, b2)

    return out.reshape(*lead, dim)


def init_params(key, dim, hidden_dim):
    """Deterministic init mimicking nn.Linear (uniform +-1/sqrt(fan_in)).
    Weights stored in bf16 (MXU-peak operands, half the HBM/VMEM bytes)."""
    ks = jax.random.split(key, 4)

    def linear(kw, kb, fan_in, fan_out):
        bound = 1.0 / math.sqrt(fan_in)
        w = jax.random.uniform(kw, (fan_in, fan_out), jnp.float32, -bound, bound)
        b = jax.random.uniform(kb, (1, fan_out), jnp.float32, -bound, bound)
        return w.astype(jnp.bfloat16), b

    w1, b1 = linear(ks[0], ks[1], dim, hidden_dim)
    w2, b2 = linear(ks[2], ks[3], hidden_dim, dim)
    return dict(w1=w1, b1=b1, w2=w2, b2=b2)


def reference(x, params):
    """Plain-JAX f32 reference matching the PyTorch forward (exact erf GELU)."""
    w1 = params["w1"].astype(jnp.float32)
    w2 = params["w2"].astype(jnp.float32)
    h = x @ w1 + params["b1"]
    h = jax.nn.gelu(h, approximate=False)
    return h @ w2 + params["b2"]


if __name__ == "__main__":
    B, L, dim, hidden_dim = 2, 8, 128, 256

    key = jax.random.PRNGKey(0)
    k_x, k_p = jax.random.split(key)
    x = jax.random.normal(k_x, (B, L, dim), jnp.float32)
    params = init_params(k_p, dim, hidden_dim)

    out = feed_forward(x, params)
    out = jax.block_until_ready(out)

    ref = reference(x, params)
    assert out.shape == (B, L, dim)
    # bf16 matmul operands + approx reciprocal in erf -> loosened tolerance.
    assert jnp.allclose(out, ref, atol=3e-2, rtol=3e-2), "mismatch vs reference"

    print("KERNEL_OK")
</pallas_src>

<mosaic_0001>
module attributes {stable_mosaic.version = 11 : i64} {
  func.func @feed_forward_kernel(%arg0: i32, %arg1: i32, %arg2: memref<16x128xf32, #tpu.memory_space<vmem>>, %arg3: memref<128x256xbf16, #tpu.memory_space<vmem>>, %arg4: memref<1x256xf32, #tpu.memory_space<vmem>>, %arg5: memref<256x128xbf16, #tpu.memory_space<vmem>>, %arg6: memref<1x128xf32, #tpu.memory_space<vmem>>, %arg7: memref<16x128xf32, #tpu.memory_space<vmem>>, %arg8: memref<16x128xf32, #tpu.memory_space<vmem>>) attributes {dimension_semantics = [#tpu.dimension_semantics<parallel>, #tpu.dimension_semantics<arbitrary>], iteration_bounds = array<i64: 1, 1>, scalar_prefetch = 0 : i64, scratch_operands = 1 : i64, tpu.core_type = #tpu.core_type<tc>, window_params = [{transform_indices = @transform_0, window_bounds = array<i64: 16, 128>}, {transform_indices = @transform_1, window_bounds = array<i64: 128, 256>}, {transform_indices = @transform_2, window_bounds = array<i64: 1, 256>}, {transform_indices = @transform_3, window_bounds = array<i64: 256, 128>}, {pipeline_mode = #tpu.pipeline_mode<synchronous>, transform_indices = @transform_4, window_bounds = array<i64: 1, 128>}, {transform_indices = @transform_5, window_bounds = array<i64: 16, 128>}]} {
    %c0_i32 = arith.constant 0 : i32
    %0 = arith.cmpi eq, %arg1, %c0_i32 : i32
    %1 = arith.extui %0 : i1 to i32
    %c0_i32_0 = arith.constant 0 : i32
    %2 = arith.cmpi ne, %1, %c0_i32_0 : i32
    scf.if %2 {
      %cst_30 = arith.constant 0.000000e+00 : f32
      %59 = vector.broadcast %cst_30 : f32 to vector<16x128xf32>
      %c0_31 = arith.constant 0 : index
      %c0_32 = arith.constant 0 : index
      %60 = vector.load %arg8[%c0_31, %c0_32] : memref<16x128xf32, #tpu.memory_space<vmem>>, vector<16x128xf32>
      tpu.vector_store %arg8[%c0_31, %c0_32], %59 {strides = array<i32>} : memref<16x128xf32, #tpu.memory_space<vmem>>, vector<16x128xf32>,
    } else {
    }
    %c0 = arith.constant 0 : index
    %c0_1 = arith.constant 0 : index
    %3 = vector.load %arg2[%c0, %c0_1] : memref<16x128xf32, #tpu.memory_space<vmem>>, vector<16x128xf32>
    %4 = arith.truncf %3 : vector<16x128xf32> to vector<16x128xbf16>
    %c0_2 = arith.constant 0 : index
    %c0_3 = arith.constant 0 : index
    %5 = vector.load %arg3[%c0_2, %c0_3] : memref<128x256xbf16, #tpu.memory_space<vmem>>, vector<128x256xbf16>
    %cst = arith.constant dense<0.000000e+00> : vector<16x256xf32>
    %6 = tpu.matmul %4, %5, %cst {dimension_numbers = #tpu.dot_dimension_numbers<[1], [0], [0], [1], [0, 0, 1, 1], [], []>} : vector<16x128xbf16>, vector<128x256xbf16>, vector<16x256xf32> -> vector<16x256xf32>
    %c0_4 = arith.constant 0 : index
    %c0_5 = arith.constant 0 : index
    %7 = vector.load %arg4[%c0_4, %c0_5] : memref<1x256xf32, #tpu.memory_space<vmem>>, vector<1x256xf32>
    %8 = vector.broadcast %7 : vector<1x256xf32> to vector<16x256xf32>
    %9 = arith.addf %6, %8 : vector<16x256xf32>
    %cst_6 = arith.constant 5.000000e-01 : f32
    %10 = vector.broadcast %cst_6 : f32 to vector<16x256xf32>
    %11 = arith.mulf %10, %9 : vector<16x256xf32>
    %cst_7 = arith.constant 0.707106769 : f32
    %12 = vector.broadcast %cst_7 : f32 to vector<16x256xf32>
    %13 = arith.mulf %9, %12 : vector<16x256xf32>
    %cst_8 = arith.constant 0.000000e+00 : f32
    %14 = vector.broadcast %cst_8 : f32 to vector<16x256xf32>
    %15 = arith.cmpf oge, %13, %14 : vector<16x256xf32>
    %cst_9 = arith.constant 1.000000e+00 : f32
    %cst_10 = arith.constant -1.000000e+00 : f32
    %16 = vector.broadcast %cst_9 : f32 to vector<16x256xf32>
    %17 = vector.broadcast %cst_10 : f32 to vector<16x256xf32>
    %18 = arith.select %15, %16, %17 : vector<16x256xi1>, vector<16x256xf32>
    %19 = math.absf %13 : vector<16x256xf32>
    %cst_11 = arith.constant 0.327591091 : f32
    %20 = vector.broadcast %cst_11 : f32 to vector<16x256xf32>
    %21 = arith.mulf %20, %19 : vector<16x256xf32>
    %cst_12 = arith.constant 1.000000e+00 : f32
    %22 = vector.broadcast %cst_12 : f32 to vector<16x256xf32>
    %23 = arith.addf %22, %21 : vector<16x256xf32>
    %24 = tpu.reciprocal %23 {approx = true} : vector<16x256xf32> -> vector<16x256xf32>
    %cst_13 = arith.constant 1.06140542 : f32
    %25 = vector.broadcast %cst_13 : f32 to vector<16x256xf32>
    %26 = arith.mulf %24, %25 : vector<16x256xf32>
    %cst_14 = arith.constant -1.45315206 : f32
    %27 = vector.broadcast %cst_14 : f32 to vector<16x256xf32>
    %28 = arith.addf %27, %26 : vector<16x256xf32>
    %29 = arith.mulf %24, %28 : vector<16x256xf32>
    %cst_15 = arith.constant 1.42141378 : f32
    %30 = vector.broadcast %cst_15 : f32 to vector<16x256xf32>
    %31 = arith.addf %30, %29 : vector<16x256xf32>
    %32 = arith.mulf %24, %31 : vector<16x256xf32>
    %cst_16 = arith.constant -0.284496725 : f32
    %33 = vector.broadcast %cst_16 : f32 to vector<16x256xf32>
    %34 = arith.addf %33, %32 : vector<16x256xf32>
    %35 = arith.mulf %24, %34 : vector<16x256xf32>
    %cst_17 = arith.constant 0.254829586 : f32
    %36 = vector.broadcast %cst_17 : f32 to vector<16x256xf32>
    %37 = arith.addf %36, %35 : vector<16x256xf32>
    %38 = arith.mulf %24, %37 : vector<16x256xf32>
    %cst_18 = arith.constant 0.000000e+00 : f32
    %39 = vector.broadcast %cst_18 : f32 to vector<16x256xf32>
    %40 = arith.subf %39, %19 : vector<16x256xf32>
    %41 = arith.mulf %40, %19 : vector<16x256xf32>
    %42 = math.exp %41 : vector<16x256xf32>
    %43 = arith.mulf %38, %42 : vector<16x256xf32>
    %cst_19 = arith.constant 1.000000e+00 : f32
    %44 = vector.broadcast %cst_19 : f32 to vector<16x256xf32>
    %45 = arith.subf %44, %43 : vector<16x256xf32>
    %46 = arith.mulf %18, %45 : vector<16x256xf32>
    %cst_20 = arith.constant 1.000000e+00 : f32
    %47 = vector.broadcast %cst_20 : f32 to vector<16x256xf32>
    %48 = arith.addf %47, %46 : vector<16x256xf32>
    %49 = arith.mulf %11, %48 : vector<16x256xf32>
    %c0_21 = arith.constant 0 : index
    %c0_22 = arith.constant 0 : index
    %50 = vector.load %arg8[%c0_21, %c0_22] : memref<16x128xf32, #tpu.memory_space<vmem>>, vector<16x128xf32>
    %51 = arith.truncf %49 : vector<16x256xf32> to vector<16x256xbf16>
    %c0_23 = arith.constant 0 : index
    %c0_24 = arith.constant 0 : index
    %52 = vector.load %arg5[%c0_23, %c0_24] : memref<256x128xbf16, #tpu.memory_space<vmem>>, vector<256x128xbf16>
    %cst_25 = arith.constant dense<0.000000e+00> : vector<16x128xf32>
    %53 = tpu.matmul %51, %52, %cst_25 {dimension_numbers = #tpu.dot_dimension_numbers<[1], [0], [0], [1], [0, 0, 1, 1], [], []>} : vector<16x256xbf16>, vector<256x128xbf16>, vector<16x128xf32> -> vector<16x128xf32>
    %54 = arith.addf %50, %53 : vector<16x128xf32>
    %c0_26 = arith.constant 0 : index
    %c0_27 = arith.constant 0 : index
    %55 = vector.load %arg8[%c0_26, %c0_27] : memref<16x128xf32, #tpu.memory_space<vmem>>, vector<16x128xf32>
    tpu.vector_store %arg8[%c0_26, %c0_27], %54 {strides = array<i32>} : memref<16x128xf32, #tpu.memory_space<vmem>>, vector<16x128xf32>,
    %c0_i32_28 = arith.constant 0 : i32
    %56 = arith.cmpi eq, %arg1, %c0_i32_28 : i32
    %57 = arith.extui %56 : i1 to i32
    %c0_i32_29 = arith.constant 0 : i32
    %58 = arith.cmpi ne, %57, %c0_i32_29 : i32
    scf.if %58 {
      %c0_30 = arith.constant 0 : index
      %c0_31 = arith.constant 0 : index
      %59 = vector.load %arg8[%c0_30, %c0_31] : memref<16x128xf32, #tpu.memory_space<vmem>>, vector<16x128xf32>
      %c0_32 = arith.constant 0 : index
      %c0_33 = arith.constant 0 : index
      %60 = vector.load %arg6[%c0_32, %c0_33] : memref<1x128xf32, #tpu.memory_space<vmem>>, vector<1x128xf32>
      %61 = vector.broadcast %60 : vector<1x128xf32> to vector<16x128xf32>
      %62 = arith.addf %59, %61 : vector<16x128xf32>
      %c0_34 = arith.constant 0 : index
      %c0_35 = arith.constant 0 : index
      %63 = vector.load %arg7[%c0_34, %c0_35] : memref<16x128xf32, #tpu.memory_space<vmem>>, vector<16x128xf32>
      tpu.vector_store %arg7[%c0_34, %c0_35], %62 {strides = array<i32>} : memref<16x128xf32, #tpu.memory_space<vmem>>, vector<16x128xf32>,
    } else {
    }
    return
  }
  func.func @transform_0(%arg0: i32, %arg1: i32) -> (i32, i32) {
    %c0_i32 = arith.constant 0 : i32
    %c0_i32_0 = arith.constant 0 : i32
    return %arg0, %c0_i32 : i32, i32
  }
  func.func @transform_1(%arg0: i32, %arg1: i32) -> (i32, i32) {
    %c0_i32 = arith.constant 0 : i32
    %c0_i32_0 = arith.constant 0 : i32
    return %c0_i32, %arg1 : i32, i32
  }
  func.func @transform_2(%arg0: i32, %arg1: i32) -> (i32, i32) {
    %c0_i32 = arith.constant 0 : i32
    %c0_i32_0 = arith.constant 0 : i32
    return %c0_i32, %arg1 : i32, i32
  }
  func.func @transform_3(%arg0: i32, %arg1: i32) -> (i32, i32) {
    %c0_i32 = arith.constant 0 : i32
    %c0_i32_0 = arith.constant 0 : i32
    return %arg1, %c0_i32 : i32, i32
  }
  func.func @transform_4(%arg0: i32, %arg1: i32) -> (i32, i32) {
    %c0_i32 = arith.constant 0 : i32
    %c0_i32_0 = arith.constant 0 : i32
    %c0_i32_1 = arith.constant 0 : i32
    return %c0_i32, %c0_i32_0 : i32, i32
  }
  func.func @transform_5(%arg0: i32, %arg1: i32) -> (i32, i32) {
    %c0_i32 = arith.constant 0 : i32
    %c0_i32_0 = arith.constant 0 : i32
    return %arg0, %c0_i32 : i32, i32
  }
}

</mosaic_0001>

<bundles_post_ra>
// kernel: tpu_custom_call.1
= control target key start
LH: loop header
LB: loop body
LE: loop exit
PB: predicated region body
PF: predicated region fallthrough
CT: control target
= control target key end

     0   :  { %10 = vsyncpa [#allocation4], 0  ;;  %s895_s0 = inlined_call_operand.hbm [shape: f32[16,128], index: 0, kind: input, shape index: {}]   ;;  %s896_s1 = inlined_call_operand.hbm [shape: bf16[128,256], index: 1, kind: input, shape index: {}]   ;;  %s897_s2 = inlined_call_operand.vmem [shape: f32[1,256], index: 2, kind: input, shape index: {}]   ;;  %s898_s3 = inlined_call_operand.hbm [shape: bf16[256,128], index: 3, kind: input, shape index: {}]   ;;  %s899_s4 = inlined_call_operand.vmem [shape: f32[1,128], index: 4, kind: input, shape index: {}]   ;;  %s900_s5 = inlined_call_operand.hbm [shape: f32[16,128], index: 5, kind: output, shape index: {}]  }
   0x1   :  { %11 = vsyncpa [#allocation7], 0 }
   0x2   :  { %12 = vsyncpa [#allocation5], 0  ;;  %s753_s18 = smov [#allocation6]   ;;  %s754_s20 = smov [#allocation3]  }
   0x3   :  { %s30_s19 = sshll.u32 %s753_s18, 4  ;;  %s18_s21 = sshll.u32 %s754_s20, 4  ;;  %s31_s19 = int_to_ptr.vmem [resolvable:$true] %s30_s19  ;;  %s793_s21 = int_to_ptr.vmem [resolvable:$true] %s18_s21 }
   0x4   :  { %s659_s24 = scalar_lea.hbm %s896_s1, 2048 }
   0x5   :  { %p660_p0 = scmp.ne.s32.totalorder %s896_s1, %s659_s24  ;;  %p663_p1 = scmp.lt.u32.totalorder %s659_s24, %s896_s1 }
   0x7   :  { %p665_p2 = pnand %p663_p1, %p660_p0 }
   0x9   :  { %668 = shalt.err (!%p665_p2)
}
   0xa   :  { %s669_s29 = scalar_lea.vmem %s31_s19, 2048  ;;  %p674_p4 = scmp.lt.s32.totalorder %s31_s19, %s31_s19 }
   0xb   :  { %p670_p3 = scmp.ne.s32.totalorder %s31_s19, %s669_s29  ;;  %p675_p5 = scmp.lt.s32.totalorder %s669_s29, %s669_s29 }
   0xd   :  { %p676_p6 = por %p675_p5, %p674_p4 }
   0xf   :  { %p677_p7 = pnand %p676_p6, %p670_p3 }
  0x11   :  { %680 = shalt.err (!%p677_p7)
}
  0x12   :  { %s755_s30 = smov 128   ;;  %s756_s6 = smov 8  }
  0x13   :  { %36 = dma.hbm_to_vmem [thread:$0]  %s896_s1, 2048, %s31_s19, [#allocation7], %s755_s30, %s755_s30, %s756_s6  }
  0x14   :  { %s681_s11 = scalar_lea.hbm %s895_s0, 256 }
  0x15   :  { %p682_p8 = scmp.ne.s32.totalorder %s895_s0, %s681_s11  ;;  %p685_p9 = scmp.lt.u32.totalorder %s681_s11, %s895_s0 }
  0x17   :  { %p687_p10 = pnand %p685_p9, %p682_p8 }
  0x19   :  { %690 = shalt.err (!%p687_p10)
}
  0x1a   :  { %s691_s16 = scalar_lea.vmem %s793_s21, 256  ;;  %p696_p12 = scmp.lt.s32.totalorder %s793_s21, %s793_s21 }
  0x1b   :  { %p692_p11 = scmp.ne.s32.totalorder %s793_s21, %s691_s16  ;;  %p697_p13 = scmp.lt.s32.totalorder %s691_s16, %s691_s16 }
  0x1d   :  { %p698_p0 = por %p697_p13, %p696_p12 }
  0x1f   :  { %p699_p1 = pnand %p698_p0, %p692_p11 }
  0x21   :  { %702 = shalt.err (!%p699_p1)
}
  0x22   :  { %24 = dma.hbm_to_vmem [thread:$0]  %s895_s0, 256, %s793_s21, [#allocation4], %s755_s30, %s755_s30, %s756_s6  }
  0x23   :  { %s757_s18 = smov [#allocation8]   ;;  %s703_s23 = scalar_lea.hbm %s898_s3, 2048 }
  0x24   :  { %s44_s19 = sshll.u32 %s757_s18, 4  ;;  %p704_p2 = scmp.ne.s32.totalorder %s898_s3, %s703_s23  ;;  %s45_s19 = int_to_ptr.vmem [resolvable:$true] %s44_s19 }
  0x25   :  { %p707_p3 = scmp.lt.u32.totalorder %s703_s23, %s898_s3 }
  0x27   :  { %p709_p4 = pnand %p707_p3, %p704_p2 }
  0x29   :  { %712 = shalt.err (!%p709_p4)
}
  0x2a   :  { %s713_s28 = scalar_lea.vmem %s45_s19, 2048  ;;  %p718_p6 = scmp.lt.s32.totalorder %s45_s19, %s45_s19 }
  0x2b   :  { %p714_p5 = scmp.ne.s32.totalorder %s45_s19, %s713_s28  ;;  %p719_p7 = scmp.lt.s32.totalorder %s713_s28, %s713_s28 }
  0x2d   :  { %p720_p8 = por %p719_p7, %p718_p6 }
  0x2f   :  { %p721_p9 = pnand %p720_p8, %p714_p5 }
  0x31   :  { %724 = shalt.err (!%p721_p9)
}
  0x32   :  { %s758_s0 = smov 64   ;;  %s759_s21 = smov 4  }
  0x33   :  { %50 = dma.hbm_to_vmem [thread:$0]  %s898_s3, 2048, %s45_s19, [#allocation7], %s758_s0, %s758_s0, %s759_s21  }
  0x34   :  { %747 = dma.done.wait [#allocation4], 256  }
  0x35   :  { %748 = vsyncadd [#allocation4], 4294967040 }
  0x36   :  { %749 = dma.done.wait [#allocation7], 4096  }
  0x37   :  { %750 = vsyncadd [#allocation7], 4294963200  ;;  %v760_v0 = vmov 0   ;;  %v603_v1 = vld [vmem:[#allocation6 + $0x4] ss:$8 sps:$4 sm:$0xff]   ;;  %v69_v17 = vld [vmem:[#allocation3] sm:$0xff]  ;;  %v90_v36 = vlaneseq }
  0x38   :  { %212 = vmatprep.mubr.bf16.mxu0 %v760_v0  ;;  %v605_v2 = vld [vmem:[#allocation6] ss:$8 sps:$4 sm:$0xff]   ;;  %180 = vmatprep.subr.bf16.mxu0 %v603_v1  ;;  %v606_v3 = vld [vmem:[#allocation6 + $0x14] ss:$8 sps:$4 sm:$0xff]   ;;  %v608_v4 = vld [vmem:[#allocation6 + $0x10] ss:$8 sps:$4 sm:$0xff]  }
  0x39   :  { %181 = vmatpush1.bf16.msra.mxu0 %v605_v2  ;;  %v609_v5 = vld [vmem:[#allocation6 + $0x24] ss:$8 sps:$4 sm:$0xff]   ;;  %v611_v6 = vld [vmem:[#allocation6 + $0x20] ss:$8 sps:$4 sm:$0xff]   ;;  %v612_v7 = vld [vmem:[#allocation6 + $0x34] ss:$8 sps:$4 sm:$0xff]  }
  0x3a   :  { %182 = vmatprep.subr.bf16.mxu0 %v606_v3  ;;  %v614_v8 = vld [vmem:[#allocation6 + $0x30] ss:$8 sps:$4 sm:$0xff]   ;;  %v615_v9 = vld [vmem:[#allocation6 + $0x44] ss:$8 sps:$4 sm:$0xff]   ;;  %v617_v10 = vld [vmem:[#allocation6 + $0x40] ss:$8 sps:$4 sm:$0xff]  }
  0x3b   :  { %v618_v11 = vld [vmem:[#allocation6 + $0x54] ss:$8 sps:$4 sm:$0xff]   ;;  %v620_v12 = vld [vmem:[#allocation6 + $0x50] ss:$8 sps:$4 sm:$0xff]   ;;  %v621_v13 = vld [vmem:[#allocation6 + $0x64] ss:$8 sps:$4 sm:$0xff]  }
  0x3c   :  { %v623_v14 = vld [vmem:[#allocation6 + $0x60] ss:$8 sps:$4 sm:$0xff]   ;;  %v624_v15 = vld [vmem:[#allocation6 + $0x74] ss:$8 sps:$4 sm:$0xff]   ;;  %v626_v16 = vld [vmem:[#allocation6 + $0x70] ss:$8 sps:$4 sm:$0xff]  }
  0x3d   :  { %183 = vmatpush1.bf16.msra.mxu0 %v608_v4  ;;  %v70_v18 = vld [vmem:[#allocation3 + $0x8] sm:$0xff]  ;;  %v627_v20 = vld [vmem:[#allocation8 + $0x40] sm:$0xff]   ;;  %v629_v22 = vld [vmem:[#allocation8 + $0x48] sm:$0xff]   ;;  %v91_v37 = vshrl.u32 %v90_v36, 7  ;;  %s762_s10 = smov [#allocation9]  }
  0x3e   :  { %184 = vmatprep.subr.bf16.mxu0 %v609_v5  ;;  %v71_v19 = vpack.c.bf16 %v70_v18, %v69_v17  ;;  %v628_v21 = vld [vmem:[#allocation8] sm:$0xff]   ;;  %571 = vmatprep.subr.bf16.mxu1 %v627_v20  ;;  %v630_v23 = vld [vmem:[#allocation8 + $0x8] sm:$0xff]   ;;  %v631_v24 = vld [vmem:[#allocation8 + $0x50] sm:$0xff]   ;;  %s525_s11 = sshll.u32 %s762_s10, 4  ;;  %s526_s11 = int_to_ptr.vmem [resolvable:$true] %s525_s11 }
  0x3f   :  { %572 = vmatpush3.bf16.msra.mxu1 %v628_v21  ;;  %v632_v25 = vld [vmem:[#allocation8 + $0x10] sm:$0xff]   ;;  %v633_v26 = vld [vmem:[#allocation8 + $0x58] sm:$0xff]   ;;  %v635_v28 = vld [vmem:[#allocation8 + $0x60] sm:$0xff]   ;;  %v92_v38 = vsub.s32 0, %v91_v37  ;;  %v96_v40 = vsub.s32 1, %v91_v37  ;;  %s725_s12 = scalar_lea.vmem %s526_s11, 256  ;;  %p730_p11 = scmp.lt.s32.totalorder %s526_s11, %s526_s11 }
  0x40   :  { %573 = vmatprep.subr.bf16.mxu1 %v629_v22  ;;  %v634_v27 = vld [vmem:[#allocation8 + $0x18] sm:$0xff]   ;;  %v636_v29 = vld [vmem:[#allocation8 + $0x20] sm:$0xff]   ;;  %v637_v30 = vld [vmem:[#allocation8 + $0x68] sm:$0xff]   ;;  %p726_p10 = scmp.ne.s32.totalorder %s526_s11, %s725_s12  ;;  %p731_p12 = scmp.lt.s32.totalorder %s725_s12, %s725_s12 }
  0x41   :  { %185 = vmatpush1.bf16.msra.mxu0 %v611_v6  ;;  %v638_v31 = vld [vmem:[#allocation8 + $0x28] sm:$0xff]   ;;  %v639_v32 = vld [vmem:[#allocation8 + $0x70] sm:$0xff]   ;;  %v641_v34 = vld [vmem:[#allocation8 + $0x78] sm:$0xff]  }
  0x42   :  { %186 = vmatprep.subr.bf16.mxu0 %v612_v7  ;;  %v640_v33 = vld [vmem:[#allocation8 + $0x30] sm:$0xff]   ;;  %v642_v35 = vld [vmem:[#allocation8 + $0x38] sm:$0xff]   ;;  %p732_p13 = por %p731_p12, %p730_p11 }
  0x43   :  { %574 = vmatpush3.bf16.msra.mxu1 %v630_v23  ;;  %v88_v39 = vld [vmem:[%s897_s2] sm:$0x3] }
  0x44   :  { %575 = vmatprep.subr.bf16.mxu1 %v631_v24  ;;  %v93_v41 = vrot.slane %v88_v39, %v92_v38  ;;  %v97_v42 = vrot.slane %v88_v39, %v96_v40  ;;  %p733_p0 = pnand %p732_p13, %p726_p10 }
  0x45   :  { %187 = vmatpush1.bf16.msra.mxu0 %v614_v8 }
  0x46   :  { %188 = vmatprep.subr.bf16.mxu0 %v615_v9 }
  0x47   :  { %576 = vmatpush3.bf16.msra.mxu1 %v632_v25 }
  0x48   :  { %577 = vmatprep.subr.bf16.mxu1 %v633_v26 }
  0x49   :  { %189 = vmatpush1.bf16.msra.mxu0 %v617_v10 }
  0x4a   :  { %190 = vmatprep.subr.bf16.mxu0 %v618_v11 }
  0x4b   :  { %578 = vmatpush3.bf16.msra.mxu1 %v634_v27 }
  0x4c   :  { %579 = vmatprep.subr.bf16.mxu1 %v635_v28 }
  0x4d   :  { %191 = vmatpush1.bf16.msra.mxu0 %v620_v12 }
  0x4e   :  { %192 = vmatprep.subr.bf16.mxu0 %v621_v13 }
  0x4f   :  { %580 = vmatpush3.bf16.msra.mxu1 %v636_v29 }
  0x50   :  { %581 = vmatprep.subr.bf16.mxu1 %v637_v30 }
  0x51   :  { %193 = vmatpush1.bf16.msra.mxu0 %v623_v14 }
  0x52   :  { %194 = vmatprep.subr.bf16.mxu0 %v624_v15 }
  0x53   :  { %582 = vmatpush3.bf16.msra.mxu1 %v638_v31 }
  0x54   :  { %583 = vmatprep.subr.bf16.mxu1 %v639_v32 }
  0x55   :  { %195 = vmatpush1.bf16.msra.mxu0 %v626_v16 }
  0x57   :  { %584 = vmatpush3.bf16.msra.mxu1 %v640_v33 }
  0x58   :  { %213 = vmatmul.mubr.bf16.vlgmr.msra.gmra.mrb[0].mxu0 %v71_v19  ;;  %585 = vmatprep.subr.bf16.mxu1 %v641_v34 }
  0x5b   :  { %586 = vmatpush3.bf16.msra.mxu1 %v642_v35 }
 0x12b   :  { %v214_v43 = vpop.f32.mrb[0].mxu0 }
 0x12c   :  { %v845_v44 = vadd.f32 %v214_v43, %v93_v41  ;;  %v216_v45 = vpop.f32.mrb[1].mxu0 }
 0x12d   :  { %v847_v46 = vadd.f32 %v216_v45, %v97_v42  ;;  %v218_v47 = vpop.f32.mrb[2].mxu0 }
 0x12e   :  { %v850_v48 = vmul.f32 0.70710677, %v845_v44  ;;  %v852_v49 = vadd.f32 %v218_v47, %v93_v41  ;;  %v220_v50 = vpop.f32.mrb[3].mxu0 }
 0x12f   :  { %v855_v51 = vmul.f32 0.70710677, %v847_v46  ;;  %v857_v52 = vadd.f32 %v220_v50, %v97_v42 }
 0x130   :  { %v239_v53 = vand.u32 2147483647, %v850_v48  ;;  %v861_v54 = vmul.f32 0.70710677, %v852_v49  ;;  %vm231_vm0 = vcmp.ge.f32.partialorder %v850_v48, 0.0 }
 0x131   :  { %v240_v55 = vand.u32 2147483647, %v855_v51  ;;  %v866_v59 = vmul.f32 0.70710677, %v857_v52  ;;  %vm232_vm1 = vcmp.ge.f32.partialorder %v855_v51, 0.0 }
 0x132   :  { %v243_v56 = vmul.f32 0.3275911, %v239_v53  ;;  %v241_v57 = vand.u32 2147483647, %v861_v54  ;;  %v291_v3 = vsub.f32 0.0, %v239_v53  ;;  %vm233_vm2 = vcmp.ge.f32.partialorder %v861_v54, 0.0 }
 0x133   :  { %v244_v58 = vmul.f32 0.3275911, %v240_v55  ;;  %v242_v63 = vand.u32 2147483647, %v866_v59  ;;  %v292_v4 = vsub.f32 0.0, %v240_v55  ;;  %vm234_vm3 = vcmp.ge.f32.partialorder %v866_v59, 0.0 }
 0x134   :  { %v247_v60 = vadd.f32 1.0, %v243_v56  ;;  %v245_v61 = vmul.f32 0.3275911, %v241_v57  ;;  %v295_v6 = vmul.f32 %v291_v3, %v239_v53  ;;  %v293_v7 = vsub.f32 0.0, %v241_v57 }
 0x135   :  { %v248_v62 = vadd.f32 1.0, %v244_v58  ;;  %v246_v1 = vmul.f32 0.3275911, %v242_v63  ;;  %v296_v10 = vmul.f32 %v292_v4, %v240_v55  ;;  %v294_v11 = vsub.f32 0.0, %v242_v63 }
 0x136   :  { %643 = vrcp.f32 %v247_v60  ;;  %v249_v0 = vadd.f32 1.0, %v245_v61  ;;  %v299_v15 = vmul.f32 1.442695, %v295_v6  ;;  %v297_v16 = vmul.f32 %v293_v7, %v241_v57 }
 0x137   :  { %645 = vrcp.f32 %v248_v62  ;;  %v250_v2 = vadd.f32 1.0, %v246_v1  ;;  %v301_v19 = vmul.f32 1.442695, %v296_v10  ;;  %v298_v22 = vmul.f32 %v294_v11, %v242_v63 }
 0x138   :  { %647 = vrcp.f32 %v249_v0  ;;  %v303_v27 = vmul.f32 1.442695, %v297_v16  ;;  %v761_v4 = vmov -1.0   ;;  %v226_v59 = vmul.f32 0.5, %v857_v52 }
 0x139   :  { %649 = vrcp.f32 %v250_v2  ;;  %v305_v32 = vmul.f32 1.442695, %v298_v22  ;;  %v235_v6 = vsel %vm231_vm0, 1.0, %v761_v4  ;;  %v236_v48 = vsel %vm232_vm1, 1.0, %v761_v4 }
 0x13a   :  { %651 = vpow2.f32 %v299_v15  ;;  %v237_v15 = vsel %vm233_vm2, 1.0, %v761_v4 }
 0x13b   :  { %653 = vpow2.f32 %v301_v19  ;;  %v225_v19 = vmul.f32 0.5, %v852_v49  ;;  %v570_v49 = vld [vmem:[%s899_s4] ss:$0 sm:$0xff] }
 0x13c   :  { %655 = vpow2.f32 %v303_v27 }
 0x13d   :  { %657 = vpow2.f32 %v305_v32 }
 0x140   :  { %v644_v5 = vpop.eup %643 }
 0x141   :  { %v646_v8 = vpop.eup %645  ;;  %v255_v9 = vmul.f32 1.0614054, %v644_v5 }
 0x142   :  { %v256_v12 = vmul.f32 1.0614054, %v646_v8  ;;  %v648_v14 = vpop.eup %647 }
 0x143   :  { %v259_v13 = vadd.f32 -1.4531521, %v255_v9  ;;  %v257_v20 = vmul.f32 1.0614054, %v648_v14  ;;  %v650_v21 = vpop.eup %649 }
 0x144   :  { %v260_v17 = vadd.f32 -1.4531521, %v256_v12  ;;  %v258_v26 = vmul.f32 1.0614054, %v650_v21  ;;  %v652_v56 = vpop.eup %651 }
 0x145   :  { %v263_v18 = vmul.f32 %v644_v5, %v259_v13  ;;  %v261_v25 = vadd.f32 -1.4531521, %v257_v20  ;;  %v654_v58 = vpop.eup %653 }
 0x146   :  { %v264_v23 = vmul.f32 %v646_v8, %v260_v17  ;;  %v262_v31 = vadd.f32 -1.4531521, %v258_v26  ;;  %v656_v3 = vpop.eup %655  ;;  %v223_v17 = vmul.f32 0.5, %v845_v44 }
 0x147   :  { %v267_v24 = vadd.f32 1.4214138, %v263_v18  ;;  %v265_v30 = vmul.f32 %v648_v14, %v261_v25  ;;  %v658_v10 = vpop.eup %657  ;;  %v238_v18 = vsel %vm234_vm3, 1.0, %v761_v4 }
 0x148   :  { %v268_v28 = vadd.f32 1.4214138, %v264_v23  ;;  %v266_v36 = vmul.f32 %v650_v21, %v262_v31 }
 0x149   :  { %v271_v29 = vmul.f32 %v644_v5, %v267_v24  ;;  %v269_v35 = vadd.f32 1.4214138, %v265_v30 }
 0x14a   :  { %v272_v33 = vmul.f32 %v646_v8, %v268_v28  ;;  %v270_v40 = vadd.f32 1.4214138, %v266_v36 }
 0x14b   :  { %v275_v34 = vadd.f32 -0.28449672, %v271_v29  ;;  %v273_v39 = vmul.f32 %v648_v14, %v269_v35 }
 0x14c   :  { %v276_v37 = vadd.f32 -0.28449672, %v272_v33  ;;  %v274_v45 = vmul.f32 %v650_v21, %v270_v40 }
 0x14d   :  { %v279_v38 = vmul.f32 %v644_v5, %v275_v34  ;;  %v277_v43 = vadd.f32 -0.28449672, %v273_v39 }
 0x14e   :  { %v280_v41 = vmul.f32 %v646_v8, %v276_v37  ;;  %v278_v55 = vadd.f32 -0.28449672, %v274_v45 }
 0x14f   :  { %v283_v42 = vadd.f32 0.2548296, %v279_v38  ;;  %v281_v53 = vmul.f32 %v648_v14, %v277_v43 }
 0x150   :  { %v284_v47 = vadd.f32 0.2548296, %v280_v41  ;;  %v282_v62 = vmul.f32 %v650_v21, %v278_v55 }
 0x151   :  { %v287_v50 = vmul.f32 %v644_v5, %v283_v42  ;;  %v285_v61 = vadd.f32 0.2548296, %v281_v53 }
 0x152   :  { %v288_v57 = vmul.f32 %v646_v8, %v284_v47  ;;  %v286_v2 = vadd.f32 0.2548296, %v282_v62 }
 0x153   :  { %v307_v60 = vmul.f32 %v652_v56, %v287_v50  ;;  %v289_v1 = vmul.f32 %v648_v14, %v285_v61 }
 0x154   :  { %v308_v63 = vmul.f32 %v654_v58, %v288_v57  ;;  %v290_v9 = vmul.f32 %v650_v21, %v286_v2  ;;  %v224_v21 = vmul.f32 0.5, %v847_v46 }
 0x155   :  { %v311_v0 = vsub.f32 1.0, %v307_v60  ;;  %v309_v8 = vmul.f32 %v656_v3, %v289_v1 }
 0x156   :  { %v312_v5 = vsub.f32 1.0, %v308_v63  ;;  %v310_v12 = vmul.f32 %v658_v10, %v290_v9 }
 0x157   :  { %v315_v7 = vmul.f32 %v311_v0, %v235_v6  ;;  %v313_v11 = vsub.f32 1.0, %v309_v8 }
 0x158   :  { %v316_v13 = vmul.f32 %v312_v5, %v236_v48  ;;  %v314_v16 = vsub.f32 1.0, %v310_v12 }
 0x159   :  { %v319_v51 = vadd.f32 1.0, %v315_v7  ;;  %v317_v14 = vmul.f32 %v313_v11, %v237_v15 }
 0x15a   :  { %v318_v54 = vmul.f32 %v314_v16, %v238_v18  ;;  %v320_v22 = vadd.f32 1.0, %v316_v13 }
 0x15b   :  { %v321_v20 = vadd.f32 1.0, %v317_v14  ;;  %v323_v23 = vmul.f32 %v319_v51, %v223_v17 }
 0x15c   :  { %v322_v25 = vadd.f32 1.0, %v318_v54  ;;  %v324_v26 = vmul.f32 %v320_v22, %v224_v21 }
 0x15d   :  { %v325_v24 = vmul.f32 %v321_v20, %v225_v19 }
 0x15e   :  { %v326_v27 = vmul.f32 %v322_v25, %v226_v59 }
 0x15f   :  { %v329_v28 = vpack.c.bf16 %v325_v24, %v323_v23 }
 0x160   :  { %v330_v29 = vpack.c.bf16 %v326_v27, %v324_v26 }
 0x162   :  { %491 = vmatprep.mubr.bf16.mxu1 %v330_v29 }
 0x163   :  { %492 = vmatmul.mubr.bf16.vlgmr.msra.gmra.mrb[0].mxu1 %v329_v28 }
 0x236   :  { %v587_v44 = vpop.f32.mrb[0].mxu1 }
 0x237   :  { %v588_v30 = vpop.f32.mrb[1].mxu1 }
 0x238   :  { %v589_v31 = vadd.f32 %v588_v30, %v587_v44  ;;  %v590_v32 = vpop.f32.mrb[2].mxu1 }
 0x239   :  { %v591_v46 = vpop.f32.mrb[3].mxu1 }
 0x23a   :  { %v516_v33 = vadd.f32 %v589_v31, %v570_v49  ;;  %v592_v52 = vadd.f32 %v591_v46, %v590_v32 }
 0x23c   :  { %518 = vst [vmem:[#allocation9] sm:$0xff] %v516_v33  ;;  %v517_v34 = vadd.f32 %v592_v52, %v570_v49 }
 0x23e   :  { %519 = vst [vmem:[#allocation9 + $0x8] sm:$0xff] %v517_v34 }
 0x23f   :  { %736 = shalt.err (!%p733_p0)
}
 0x240   :  { %s737_s14 = scalar_lea.hbm %s900_s5, 256 }
 0x241   :  { %p738_p1 = scmp.ne.s32.totalorder %s900_s5, %s737_s14  ;;  %p741_p2 = scmp.lt.u32.totalorder %s737_s14, %s900_s5 }
 0x243   :  { %p743_p3 = pnand %p741_p2, %p738_p1 }
 0x245   :  { %746 = shalt.err (!%p743_p3)
}
 0x246   :  { %531 = dma.vmem_to_hbm [thread:$0]  %s526_s11, 256, %s900_s5, [#allocation5], %s755_s30, %s755_s30, %s756_s6  }
 0x247   :  { %751 = dma.done.wait [#allocation5], 256  }
 0x248   :  { %752 = vsyncadd [#allocation5], 4294967040 }
 0x249   :  { %535 = vsyncpa [#allocation4], 1 }
 0x24a   :  { %536 = vsyncpa [#allocation7], 1 }
 0x24b   :  { %537 = vsyncpa [#allocation5], 1 }

</bundles_post_ra>
